<compile_context>
chip_gen: v7x
topology: tpu7x:2x2x1
jax: 0.10.0
libtpu: 0.0.40
codegen_flags: <defaults>
</compile_context>

<pallas_src>
import functools
import math

import jax
import jax.numpy as jnp
from jax.experimental import pallas as pl
from jax.experimental.pallas import tpu as pltpu


_LANES = 128
_MAX_TILE_ROWS = 4096   # 4096 x 128 x 4 B = 2 MiB per f32 input tile
_NUM_SLICES = 2         # leading "parallel" axis; maps to the 2 TCs on v7x


def _srl_kernel(d3_ref, lo_ref, up_ref, acc_ref, *,
                inv_scale, rows, tile_rows, steps, ragged):
    """acc_ref block (1, 5, 8, 128): [s_lo, c_lo, s_up, c_up, range] partials."""
    c = pl.program_id(0)   # slice ("parallel")
    j = pl.program_id(1)   # step within slice ("arbitrary" reduction axis)

    # fresh accumulator at the start of each slice
    @pl.when(j == 0)
    def _():
        acc_ref[...] = jnp.zeros_like(acc_ref)

    d3 = d3_ref[...].astype(jnp.float32)
    lo = lo_ref[...].astype(jnp.float32)
    up = up_ref[...].astype(jnp.float32)

    # pred = d3, gt = d3 / scale  (multiply by precomputed 1/scale; exact for
    # power-of-two scales, last-ulp difference otherwise -- within tolerance).
    gt = d3 * jnp.float32(inv_scale)
    dl = (d3 - lo) - gt            # lower_threshold - gt
    du = gt - (d3 + up)            # gt - upper_threshold
    rng = jnp.abs(lo + up)         # |upper_threshold - lower_threshold|

    zero = jnp.float32(0.0)
    groups = tile_rows // 8

    def fold(x):
        # (tile_rows,128) -> (8,128): pure in-vreg VALU tree adds, no XLU.
        return jnp.sum(x.reshape(groups, 8, _LANES), axis=0)

    def accumulate(valid):
        m_lo = dl > zero
        m_up = du > zero
        r = rng
        if valid is not None:
            m_lo = jnp.logical_and(m_lo, valid)
            m_up = jnp.logical_and(m_up, valid)
            r = jnp.where(valid, r, zero)
        acc_ref[0, 0] += fold(jnp.where(m_lo, dl, zero))
        acc_ref[0, 1] += fold(m_lo.astype(jnp.float32))
        acc_ref[0, 2] += fold(jnp.where(m_up, du, zero))
        acc_ref[0, 3] += fold(m_up.astype(jnp.float32))
        acc_ref[0, 4] += fold(r)

    if ragged:
        block = c * steps + j          # logical (unclamped) block index
        start = block * tile_rows

        @pl.when(start + tile_rows <= rows)
        def _():
            accumulate(None)

        @pl.when(start + tile_rows > rows)
        def _():
            # OOB rows of the last (or over-covered) block hold garbage; mask
            # them out of ALL five accumulations (sums and counts).
            row_id = jax.lax.broadcasted_iota(jnp.int32, (tile_rows, _LANES), 0)
            accumulate(row_id < (rows - start))
    else:
        accumulate(None)


def searching_range_loss(pred_disp, gt_disp, lower_map, upper_map, disp3, alpha=0.9):
    """Pallas implementation of Searching_Range_Loss.forward."""
    if disp3.shape[-1] == gt_disp.shape[-1]:
        raise ValueError("PyTorch module is undefined when disp3.W == gt_disp.W "
                         "(`scale` is never assigned).")
    scale = gt_disp.shape[-1] // disp3.shape[-1]
    numel = math.prod(disp3.shape)

    # lane-dense layout: flatten and view as (rows, 128); no full-array pad.
    rows = -(-numel // _LANES)

    def prep(x):
        flat = x.reshape(-1)           # native dtype; cast happens in-kernel
        if rows * _LANES != numel:
            # TODO(synk): this fallback (numel % 128 != 0) still costs one XLA
            # pad pass over the input; pick shapes with numel % 128 == 0 to
            # keep the reshape a free view.
            flat = jnp.pad(flat, (0, rows * _LANES - numel))
        return flat.reshape(rows, _LANES)

    d3_2d = prep(disp3)
    lo_2d = prep(lower_map)
    up_2d = prep(upper_map)

    # tile_rows: multiple of the packed sublane tile for every input dtype.
    def sublane_mult(x):
        return 8 * max(1, 4 // jnp.dtype(x.dtype).itemsize)
    mult = max(sublane_mult(disp3), sublane_mult(lower_map), sublane_mult(upper_map))
    tile_rows = min(_MAX_TILE_ROWS, -(-rows // mult) * mult)

    nblocks = -(-rows // tile_rows)
    num_slices = min(_NUM_SLICES, nblocks)
    steps = -(-nblocks // num_slices)
    # need the in-kernel tail mask if the covered row range exceeds `rows`
    ragged = (num_slices * steps * tile_rows) != rows

    # keep every generated block index in-range: clamp over-covered blocks to
    # the last real block (its contribution is fully masked out anyway).
    last_block = nblocks - 1
    if num_slices * steps == nblocks:
        in_index = lambda c, j: (c * steps + j, 0)
    else:
        in_index = lambda c, j: (jnp.minimum(c * steps + j, last_block), 0)

    kernel = functools.partial(
        _srl_kernel,
        inv_scale=1.0 / float(scale),
        rows=rows,
        tile_rows=tile_rows,
        steps=steps,
        ragged=ragged,
    )

    in_spec = pl.BlockSpec((tile_rows, _LANES), in_index)
    # output block is resident across the "arbitrary" axis -> it IS the
    # per-slice accumulator (no extra scratch).
    out_spec = pl.BlockSpec((1, 5, 8, _LANES), lambda c, j: (c, 0, 0, 0))

    parts = pl.pallas_call(
        kernel,
        out_shape=jax.ShapeDtypeStruct((num_slices, 5, 8, _LANES), jnp.float32),
        grid_spec=pltpu.PrefetchScalarGridSpec(
            num_scalar_prefetch=0,
            grid=(num_slices, steps),
            in_specs=[in_spec, in_spec, in_spec],
            out_specs=out_spec,
        ),
        compiler_params=pltpu.CompilerParams(
            dimension_semantics=("parallel", "arbitrary"),
            vmem_limit_bytes=32 * 1024 * 1024,
        ),
    )(d3_2d, lo_2d, up_2d)

    # tiny scalar finalize in plain JAX (num_slices*5*8*128 floats)
    sums = jnp.sum(parts, axis=(0, 2, 3))
    s_lo, c_lo, s_up, c_up, rng = sums[0], sums[1], sums[2], sums[3], sums[4]
    loss_lower = s_lo / (c_lo + jnp.float32(1e-8))
    loss_upper = s_up / (c_up + jnp.float32(1e-8))
    epe_hard = rng * jnp.float32(1.0 / numel)
    a = jnp.float32(alpha)
    return a * (loss_lower + loss_upper) + (jnp.float32(1.0) - a) * epe_hard


def _reference(pred_disp, gt_disp, lower_map, upper_map, disp3, alpha=0.9):
    # plain-JAX reference of the same forward (for self-check)
    scale = gt_disp.shape[-1] // disp3.shape[-1]
    pred = disp3
    gt = disp3 / scale
    lower_thr = pred - lower_map
    upper_thr = pred + upper_map
    lmask = (lower_thr - gt > 0).astype(jnp.float32)
    umask = (gt - upper_thr > 0).astype(jnp.float32)
    loss_lower = jnp.sum(jnp.abs((lower_thr - gt) * lmask)) / (jnp.sum(lmask) + 1e-8)
    loss_upper = jnp.sum(jnp.abs((upper_thr - gt) * umask)) / (jnp.sum(umask) + 1e-8)
    epe = jnp.mean(jnp.abs(upper_thr - lower_thr))
    return alpha * (loss_lower + loss_upper) + (1.0 - alpha) * epe


if __name__ == "__main__":
    key = jax.random.PRNGKey(0)
    k1, k2, k3, k4, k5 = jax.random.split(key, 5)

    # small shapes: full-res GT (2,1,32,32), quarter-size disparity disp3 (2,1,16,16)
    N, C, H, W = 2, 1, 16, 16
    gt_disp = jax.random.uniform(k1, (N, C, 2 * H, 2 * W), jnp.float32) * 64.0
    pred_disp = jax.random.uniform(k2, (N, C, 2 * H, 2 * W), jnp.float32) * 64.0
    disp3 = jax.random.uniform(k3, (N, C, H, W), jnp.float32) * 32.0
    lower_map = jax.random.uniform(k4, (N, C, H, W), jnp.float32) * 2.0
    upper_map = jax.random.uniform(k5, (N, C, H, W), jnp.float32) * 2.0

    loss = searching_range_loss(pred_disp, gt_disp, lower_map, upper_map, disp3,
                                alpha=0.9)
    loss = jax.block_until_ready(loss)

    ref = _reference(pred_disp, gt_disp, lower_map, upper_map, disp3, alpha=0.9)
    assert jnp.allclose(loss, ref, rtol=1e-4, atol=1e-5), (loss, ref)

    print("KERNEL_OK")
</pallas_src>

<mosaic_0001>
module attributes {stable_mosaic.version = 11 : i64} {
  func.func @_srl_kernel(%arg0: i32, %arg1: i32, %arg2: memref<8x128xf32, #tpu.memory_space<vmem>>, %arg3: memref<8x128xf32, #tpu.memory_space<vmem>>, %arg4: memref<8x128xf32, #tpu.memory_space<vmem>>, %arg5: memref<1x5x8x128xf32, #tpu.memory_space<vmem>>) attributes {dimension_semantics = [#tpu.dimension_semantics<parallel>, #tpu.dimension_semantics<arbitrary>], iteration_bounds = array<i64: 1, 1>, scalar_prefetch = 0 : i64, scratch_operands = 0 : i64, tpu.core_type = #tpu.core_type<tc>, window_params = [{transform_indices = @transform_0, window_bounds = array<i64: 8, 128>}, {transform_indices = @transform_1, window_bounds = array<i64: 8, 128>}, {transform_indices = @transform_2, window_bounds = array<i64: 8, 128>}, {transform_indices = @transform_3, window_bounds = array<i64: 1, 5, 8, 128>}]} {
    %c0_i32 = arith.constant 0 : i32
    %0 = arith.cmpi eq, %arg1, %c0_i32 : i32
    %1 = arith.extui %0 : i1 to i32
    %c0_i32_0 = arith.constant 0 : i32
    %2 = arith.cmpi ne, %1, %c0_i32_0 : i32
    scf.if %2 {
      %cst_13 = arith.constant 0.000000e+00 : f32
      %25 = vector.broadcast %cst_13 : f32 to vector<1x5x8x128xf32>
      %c0_14 = arith.constant 0 : index
      %c0_15 = arith.constant 0 : index
      %c0_16 = arith.constant 0 : index
      %c0_17 = arith.constant 0 : index
      %26 = vector.load %arg5[%c0_14, %c0_15, %c0_16, %c0_17] : memref<1x5x8x128xf32, #tpu.memory_space<vmem>>, vector<1x5x8x128xf32>
      tpu.vector_store %arg5[%c0_14, %c0_15, %c0_16, %c0_17], %25 {strides = array<i32>} : memref<1x5x8x128xf32, #tpu.memory_space<vmem>>, vector<1x5x8x128xf32>,
    } else {
    }
    %c0 = arith.constant 0 : index
    %c0_1 = arith.constant 0 : index
    %3 = vector.load %arg2[%c0, %c0_1] : memref<8x128xf32, #tpu.memory_space<vmem>>, vector<8x128xf32>
    %c0_2 = arith.constant 0 : index
    %c0_3 = arith.constant 0 : index
    %4 = vector.load %arg3[%c0_2, %c0_3] : memref<8x128xf32, #tpu.memory_space<vmem>>, vector<8x128xf32>
    %c0_4 = arith.constant 0 : index
    %c0_5 = arith.constant 0 : index
    %5 = vector.load %arg4[%c0_4, %c0_5] : memref<8x128xf32, #tpu.memory_space<vmem>>, vector<8x128xf32>
    %cst = arith.constant 5.000000e-01 : f32
    %6 = vector.broadcast %cst : f32 to vector<8x128xf32>
    %7 = arith.mulf %3, %6 : vector<8x128xf32>
    %8 = arith.subf %3, %4 : vector<8x128xf32>
    %9 = arith.subf %8, %7 : vector<8x128xf32>
    %10 = arith.addf %3, %5 : vector<8x128xf32>
    %11 = arith.subf %7, %10 : vector<8x128xf32>
    %12 = arith.addf %4, %5 : vector<8x128xf32>
    %13 = math.absf %12 : vector<8x128xf32>
    %c1_i32 = arith.constant 1 : i32
    %14 = arith.muli %arg0, %c1_i32 : i32
    %15 = arith.addi %14, %arg1 : i32
    %c8_i32 = arith.constant 8 : i32
    %16 = arith.muli %15, %c8_i32 : i32
    %c8_i32_6 = arith.constant 8 : i32
    %17 = arith.addi %16, %c8_i32_6 : i32
    %c4_i32 = arith.constant 4 : i32
    %18 = arith.cmpi sle, %17, %c4_i32 : i32
    %19 = arith.extui %18 : i1 to i32
    %cst_7 = arith.constant 0.000000e+00 : f32
    %c0_i32_8 = arith.constant 0 : i32
    %20 = arith.cmpi ne, %19, %c0_i32_8 : i32
    scf.if %20 {
      %25 = vector.broadcast %cst_7 : f32 to vector<8x128xf32>
      %26 = arith.cmpf ogt, %9, %25 : vector<8x128xf32>
      %27 = vector.broadcast %cst_7 : f32 to vector<8x128xf32>
      %28 = arith.cmpf ogt, %11, %27 : vector<8x128xf32>
      %c0_13 = arith.constant 0 : index
      %c0_14 = arith.constant 0 : index
      %c0_15 = arith.constant 0 : index
      %c0_16 = arith.constant 0 : index
      %29 = vector.load %arg5[%c0_13, %c0_14, %c0_15, %c0_16] : memref<1x5x8x128xf32, #tpu.memory_space<vmem>>, vector<1x1x8x128xf32>
      %30 = vector.shape_cast %29 : vector<1x1x8x128xf32> to vector<8x128xf32>
      %31 = vector.broadcast %cst_7 : f32 to vector<8x128xf32>
      %32 = arith.select %26, %9, %31 : vector<8x128xi1>, vector<8x128xf32>
      %33 = vector.shape_cast %32 : vector<8x128xf32> to vector<1x8x128xf32>
      %cst_17 = arith.constant dense<0.000000e+00> : vector<8x128xf32>
      %34 = vector.multi_reduction <add>, %33, %cst_17 [0] : vector<1x8x128xf32> to vector<8x128xf32>
      %35 = arith.addf %30, %34 : vector<8x128xf32>
      %c0_18 = arith.constant 0 : index
      %c0_19 = arith.constant 0 : index
      %c0_20 = arith.constant 0 : index
      %c0_21 = arith.constant 0 : index
      %36 = vector.load %arg5[%c0_18, %c0_19, %c0_20, %c0_21] : memref<1x5x8x128xf32, #tpu.memory_space<vmem>>, vector<1x1x8x128xf32>
      %37 = vector.shape_cast %36 : vector<1x1x8x128xf32> to vector<8x128xf32>
      %38 = vector.shape_cast %35 : vector<8x128xf32> to vector<1x1x8x128xf32>
      tpu.vector_store %arg5[%c0_18, %c0_19, %c0_20, %c0_21], %38 {strides = array<i32>} : memref<1x5x8x128xf32, #tpu.memory_space<vmem>>, vector<1x1x8x128xf32>,
      %c0_22 = arith.constant 0 : index
      %c1 = arith.constant 1 : index
      %c0_23 = arith.constant 0 : index
      %c0_24 = arith.constant 0 : index
      %39 = vector.load %arg5[%c0_22, %c1, %c0_23, %c0_24] : memref<1x5x8x128xf32, #tpu.memory_space<vmem>>, vector<1x1x8x128xf32>
      %40 = vector.shape_cast %39 : vector<1x1x8x128xf32> to vector<8x128xf32>
      %41 = arith.extui %26 : vector<8x128xi1> to vector<8x128xi32>
      %42 = arith.sitofp %41 : vector<8x128xi32> to vector<8x128xf32>
      %43 = vector.shape_cast %42 : vector<8x128xf32> to vector<1x8x128xf32>
      %cst_25 = arith.constant dense<0.000000e+00> : vector<8x128xf32>
      %44 = vector.multi_reduction <add>, %43, %cst_25 [0] : vector<1x8x128xf32> to vector<8x128xf32>
      %45 = arith.addf %40, %44 : vector<8x128xf32>
      %c0_26 = arith.constant 0 : index
      %c1_27 = arith.constant 1 : index
      %c0_28 = arith.constant 0 : index
      %c0_29 = arith.constant 0 : index
      %46 = vector.load %arg5[%c0_26, %c1_27, %c0_28, %c0_29] : memref<1x5x8x128xf32, #tpu.memory_space<vmem>>, vector<1x1x8x128xf32>
      %47 = vector.shape_cast %46 : vector<1x1x8x128xf32> to vector<8x128xf32>
      %48 = vector.shape_cast %45 : vector<8x128xf32> to vector<1x1x8x128xf32>
      tpu.vector_store %arg5[%c0_26, %c1_27, %c0_28, %c0_29], %48 {strides = array<i32>} : memref<1x5x8x128xf32, #tpu.memory_space<vmem>>, vector<1x1x8x128xf32>,
      %c0_30 = arith.constant 0 : index
      %c2 = arith.constant 2 : index
      %c0_31 = arith.constant 0 : index
      %c0_32 = arith.constant 0 : index
      %49 = vector.load %arg5[%c0_30, %c2, %c0_31, %c0_32] : memref<1x5x8x128xf32, #tpu.memory_space<vmem>>, vector<1x1x8x128xf32>
      %50 = vector.shape_cast %49 : vector<1x1x8x128xf32> to vector<8x128xf32>
      %51 = vector.broadcast %cst_7 : f32 to vector<8x128xf32>
      %52 = arith.select %28, %11, %51 : vector<8x128xi1>, vector<8x128xf32>
      %53 = vector.shape_cast %52 : vector<8x128xf32> to vector<1x8x128xf32>
      %cst_33 = arith.constant dense<0.000000e+00> : vector<8x128xf32>
      %54 = vector.multi_reduction <add>, %53, %cst_33 [0] : vector<1x8x128xf32> to vector<8x128xf32>
      %55 = arith.addf %50, %54 : vector<8x128xf32>
      %c0_34 = arith.constant 0 : index
      %c2_35 = arith.constant 2 : index
      %c0_36 = arith.constant 0 : index
      %c0_37 = arith.constant 0 : index
      %56 = vector.load %arg5[%c0_34, %c2_35, %c0_36, %c0_37] : memref<1x5x8x128xf32, #tpu.memory_space<vmem>>, vector<1x1x8x128xf32>
      %57 = vector.shape_cast %56 : vector<1x1x8x128xf32> to vector<8x128xf32>
      %58 = vector.shape_cast %55 : vector<8x128xf32> to vector<1x1x8x128xf32>
      tpu.vector_store %arg5[%c0_34, %c2_35, %c0_36, %c0_37], %58 {strides = array<i32>} : memref<1x5x8x128xf32, #tpu.memory_space<vmem>>, vector<1x1x8x128xf32>,
      %c0_38 = arith.constant 0 : index
      %c3 = arith.constant 3 : index
      %c0_39 = arith.constant 0 : index
      %c0_40 = arith.constant 0 : index
      %59 = vector.load %arg5[%c0_38, %c3, %c0_39, %c0_40] : memref<1x5x8x128xf32, #tpu.memory_space<vmem>>, vector<1x1x8x128xf32>
      %60 = vector.shape_cast %59 : vector<1x1x8x128xf32> to vector<8x128xf32>
      %61 = arith.extui %28 : vector<8x128xi1> to vector<8x128xi32>
      %62 = arith.sitofp %61 : vector<8x128xi32> to vector<8x128xf32>
      %63 = vector.shape_cast %62 : vector<8x128xf32> to vector<1x8x128xf32>
      %cst_41 = arith.constant dense<0.000000e+00> : vector<8x128xf32>
      %64 = vector.multi_reduction <add>, %63, %cst_41 [0] : vector<1x8x128xf32> to vector<8x128xf32>
      %65 = arith.addf %60, %64 : vector<8x128xf32>
      %c0_42 = arith.constant 0 : index
      %c3_43 = arith.constant 3 : index
      %c0_44 = arith.constant 0 : index
      %c0_45 = arith.constant 0 : index
      %66 = vector.load %arg5[%c0_42, %c3_43, %c0_44, %c0_45] : memref<1x5x8x128xf32, #tpu.memory_space<vmem>>, vector<1x1x8x128xf32>
      %67 = vector.shape_cast %66 : vector<1x1x8x128xf32> to vector<8x128xf32>
      %68 = vector.shape_cast %65 : vector<8x128xf32> to vector<1x1x8x128xf32>
      tpu.vector_store %arg5[%c0_42, %c3_43, %c0_44, %c0_45], %68 {strides = array<i32>} : memref<1x5x8x128xf32, #tpu.memory_space<vmem>>, vector<1x1x8x128xf32>,
      %c0_46 = arith.constant 0 : index
      %c4 = arith.constant 4 : index
      %c0_47 = arith.constant 0 : index
      %c0_48 = arith.constant 0 : index
      %69 = vector.load %arg5[%c0_46, %c4, %c0_47, %c0_48] : memref<1x5x8x128xf32, #tpu.memory_space<vmem>>, vector<1x1x8x128xf32>
      %70 = vector.shape_cast %69 : vector<1x1x8x128xf32> to vector<8x128xf32>
      %71 = vector.shape_cast %13 : vector<8x128xf32> to vector<1x8x128xf32>
      %cst_49 = arith.constant dense<0.000000e+00> : vector<8x128xf32>
      %72 = vector.multi_reduction <add>, %71, %cst_49 [0] : vector<1x8x128xf32> to vector<8x128xf32>
      %73 = arith.addf %70, %72 : vector<8x128xf32>
      %c0_50 = arith.constant 0 : index
      %c4_51 = arith.constant 4 : index
      %c0_52 = arith.constant 0 : index
      %c0_53 = arith.constant 0 : index
      %74 = vector.load %arg5[%c0_50, %c4_51, %c0_52, %c0_53] : memref<1x5x8x128xf32, #tpu.memory_space<vmem>>, vector<1x1x8x128xf32>
      %75 = vector.shape_cast %74 : vector<1x1x8x128xf32> to vector<8x128xf32>
      %76 = vector.shape_cast %73 : vector<8x128xf32> to vector<1x1x8x128xf32>
      tpu.vector_store %arg5[%c0_50, %c4_51, %c0_52, %c0_53], %76 {strides = array<i32>} : memref<1x5x8x128xf32, #tpu.memory_space<vmem>>, vector<1x1x8x128xf32>,
    } else {
    }
    %c8_i32_9 = arith.constant 8 : i32
    %21 = arith.addi %16, %c8_i32_9 : i32
    %c4_i32_10 = arith.constant 4 : i32
    %22 = arith.cmpi sgt, %21, %c4_i32_10 : i32
    %23 = arith.extui %22 : i1 to i32
    %cst_11 = arith.constant 0.000000e+00 : f32
    %c0_i32_12 = arith.constant 0 : i32
    %24 = arith.cmpi ne, %23, %c0_i32_12 : i32
    scf.if %24 {
      %25 = tpu.iota {dimensions = array<i32: 0>} : vector<8x128xi32>
      %c4_i32_13 = arith.constant 4 : i32
      %26 = arith.subi %c4_i32_13, %16 : i32
      %27 = vector.broadcast %26 : i32 to vector<8x128xi32>
      %28 = arith.cmpi slt, %25, %27 : vector<8x128xi32>
      %29 = vector.broadcast %cst_11 : f32 to vector<8x128xf32>
      %30 = arith.cmpf ogt, %9, %29 : vector<8x128xf32>
      %31 = vector.broadcast %cst_11 : f32 to vector<8x128xf32>
      %32 = arith.cmpf ogt, %11, %31 : vector<8x128xf32>
      %33 = arith.andi %30, %28 : vector<8x128xi1>
      %34 = arith.andi %32, %28 : vector<8x128xi1>
      %35 = vector.broadcast %cst_11 : f32 to vector<8x128xf32>
      %36 = arith.select %28, %13, %35 : vector<8x128xi1>, vector<8x128xf32>
      %c0_14 = arith.constant 0 : index
      %c0_15 = arith.constant 0 : index
      %c0_16 = arith.constant 0 : index
      %c0_17 = arith.constant 0 : index
      %37 = vector.load %arg5[%c0_14, %c0_15, %c0_16, %c0_17] : memref<1x5x8x128xf32, #tpu.memory_space<vmem>>, vector<1x1x8x128xf32>
      %38 = vector.shape_cast %37 : vector<1x1x8x128xf32> to vector<8x128xf32>
      %39 = vector.broadcast %cst_11 : f32 to vector<8x128xf32>
      %40 = arith.select %33, %9, %39 : vector<8x128xi1>, vector<8x128xf32>
      %41 = vector.shape_cast %40 : vector<8x128xf32> to vector<1x8x128xf32>
      %cst_18 = arith.constant dense<0.000000e+00> : vector<8x128xf32>
      %42 = vector.multi_reduction <add>, %41, %cst_18 [0] : vector<1x8x128xf32> to vector<8x128xf32>
      %43 = arith.addf %38, %42 : vector<8x128xf32>
      %c0_19 = arith.constant 0 : index
      %c0_20 = arith.constant 0 : index
      %c0_21 = arith.constant 0 : index
      %c0_22 = arith.constant 0 : index
      %44 = vector.load %arg5[%c0_19, %c0_20, %c0_21, %c0_22] : memref<1x5x8x128xf32, #tpu.memory_space<vmem>>, vector<1x1x8x128xf32>
      %45 = vector.shape_cast %44 : vector<1x1x8x128xf32> to vector<8x128xf32>
      %46 = vector.shape_cast %43 : vector<8x128xf32> to vector<1x1x8x128xf32>
      tpu.vector_store %arg5[%c0_19, %c0_20, %c0_21, %c0_22], %46 {strides = array<i32>} : memref<1x5x8x128xf32, #tpu.memory_space<vmem>>, vector<1x1x8x128xf32>,
      %c0_23 = arith.constant 0 : index
      %c1 = arith.constant 1 : index
      %c0_24 = arith.constant 0 : index
      %c0_25 = arith.constant 0 : index
      %47 = vector.load %arg5[%c0_23, %c1, %c0_24, %c0_25] : memref<1x5x8x128xf32, #tpu.memory_space<vmem>>, vector<1x1x8x128xf32>
      %48 = vector.shape_cast %47 : vector<1x1x8x128xf32> to vector<8x128xf32>
      %49 = arith.extui %33 : vector<8x128xi1> to vector<8x128xi32>
      %50 = arith.sitofp %49 : vector<8x128xi32> to vector<8x128xf32>
      %51 = vector.shape_cast %50 : vector<8x128xf32> to vector<1x8x128xf32>
      %cst_26 = arith.constant dense<0.000000e+00> : vector<8x128xf32>
      %52 = vector.multi_reduction <add>, %51, %cst_26 [0] : vector<1x8x128xf32> to vector<8x128xf32>
      %53 = arith.addf %48, %52 : vector<8x128xf32>
      %c0_27 = arith.constant 0 : index
      %c1_28 = arith.constant 1 : index
      %c0_29 = arith.constant 0 : index
      %c0_30 = arith.constant 0 : index
      %54 = vector.load %arg5[%c0_27, %c1_28, %c0_29, %c0_30] : memref<1x5x8x128xf32, #tpu.memory_space<vmem>>, vector<1x1x8x128xf32>
      %55 = vector.shape_cast %54 : vector<1x1x8x128xf32> to vector<8x128xf32>
      %56 = vector.shape_cast %53 : vector<8x128xf32> to vector<1x1x8x128xf32>
      tpu.vector_store %arg5[%c0_27, %c1_28, %c0_29, %c0_30], %56 {strides = array<i32>} : memref<1x5x8x128xf32, #tpu.memory_space<vmem>>, vector<1x1x8x128xf32>,
      %c0_31 = arith.constant 0 : index
      %c2 = arith.constant 2 : index
      %c0_32 = arith.constant 0 : index
      %c0_33 = arith.constant 0 : index
      %57 = vector.load %arg5[%c0_31, %c2, %c0_32, %c0_33] : memref<1x5x8x128xf32, #tpu.memory_space<vmem>>, vector<1x1x8x128xf32>
      %58 = vector.shape_cast %57 : vector<1x1x8x128xf32> to vector<8x128xf32>
      %59 = vector.broadcast %cst_11 : f32 to vector<8x128xf32>
      %60 = arith.select %34, %11, %59 : vector<8x128xi1>, vector<8x128xf32>
      %61 = vector.shape_cast %60 : vector<8x128xf32> to vector<1x8x128xf32>
      %cst_34 = arith.constant dense<0.000000e+00> : vector<8x128xf32>
      %62 = vector.multi_reduction <add>, %61, %cst_34 [0] : vector<1x8x128xf32> to vector<8x128xf32>
      %63 = arith.addf %58, %62 : vector<8x128xf32>
      %c0_35 = arith.constant 0 : index
      %c2_36 = arith.constant 2 : index
      %c0_37 = arith.constant 0 : index
      %c0_38 = arith.constant 0 : index
      %64 = vector.load %arg5[%c0_35, %c2_36, %c0_37, %c0_38] : memref<1x5x8x128xf32, #tpu.memory_space<vmem>>, vector<1x1x8x128xf32>
      %65 = vector.shape_cast %64 : vector<1x1x8x128xf32> to vector<8x128xf32>
      %66 = vector.shape_cast %63 : vector<8x128xf32> to vector<1x1x8x128xf32>
      tpu.vector_store %arg5[%c0_35, %c2_36, %c0_37, %c0_38], %66 {strides = array<i32>} : memref<1x5x8x128xf32, #tpu.memory_space<vmem>>, vector<1x1x8x128xf32>,
      %c0_39 = arith.constant 0 : index
      %c3 = arith.constant 3 : index
      %c0_40 = arith.constant 0 : index
      %c0_41 = arith.constant 0 : index
      %67 = vector.load %arg5[%c0_39, %c3, %c0_40, %c0_41] : memref<1x5x8x128xf32, #tpu.memory_space<vmem>>, vector<1x1x8x128xf32>
      %68 = vector.shape_cast %67 : vector<1x1x8x128xf32> to vector<8x128xf32>
      %69 = arith.extui %34 : vector<8x128xi1> to vector<8x128xi32>
      %70 = arith.sitofp %69 : vector<8x128xi32> to vector<8x128xf32>
      %71 = vector.shape_cast %70 : vector<8x128xf32> to vector<1x8x128xf32>
      %cst_42 = arith.constant dense<0.000000e+00> : vector<8x128xf32>
      %72 = vector.multi_reduction <add>, %71, %cst_42 [0] : vector<1x8x128xf32> to vector<8x128xf32>
      %73 = arith.addf %68, %72 : vector<8x128xf32>
      %c0_43 = arith.constant 0 : index
      %c3_44 = arith.constant 3 : index
      %c0_45 = arith.constant 0 : index
      %c0_46 = arith.constant 0 : index
      %74 = vector.load %arg5[%c0_43, %c3_44, %c0_45, %c0_46] : memref<1x5x8x128xf32, #tpu.memory_space<vmem>>, vector<1x1x8x128xf32>
      %75 = vector.shape_cast %74 : vector<1x1x8x128xf32> to vector<8x128xf32>
      %76 = vector.shape_cast %73 : vector<8x128xf32> to vector<1x1x8x128xf32>
      tpu.vector_store %arg5[%c0_43, %c3_44, %c0_45, %c0_46], %76 {strides = array<i32>} : memref<1x5x8x128xf32, #tpu.memory_space<vmem>>, vector<1x1x8x128xf32>,
      %c0_47 = arith.constant 0 : index
      %c4 = arith.constant 4 : index
      %c0_48 = arith.constant 0 : index
      %c0_49 = arith.constant 0 : index
      %77 = vector.load %arg5[%c0_47, %c4, %c0_48, %c0_49] : memref<1x5x8x128xf32, #tpu.memory_space<vmem>>, vector<1x1x8x128xf32>
      %78 = vector.shape_cast %77 : vector<1x1x8x128xf32> to vector<8x128xf32>
      %79 = vector.shape_cast %36 : vector<8x128xf32> to vector<1x8x128xf32>
      %cst_50 = arith.constant dense<0.000000e+00> : vector<8x128xf32>
      %80 = vector.multi_reduction <add>, %79, %cst_50 [0] : vector<1x8x128xf32> to vector<8x128xf32>
      %81 = arith.addf %78, %80 : vector<8x128xf32>
      %c0_51 = arith.constant 0 : index
      %c4_52 = arith.constant 4 : index
      %c0_53 = arith.constant 0 : index
      %c0_54 = arith.constant 0 : index
      %82 = vector.load %arg5[%c0_51, %c4_52, %c0_53, %c0_54] : memref<1x5x8x128xf32, #tpu.memory_space<vmem>>, vector<1x1x8x128xf32>
      %83 = vector.shape_cast %82 : vector<1x1x8x128xf32> to vector<8x128xf32>
      %84 = vector.shape_cast %81 : vector<8x128xf32> to vector<1x1x8x128xf32>
      tpu.vector_store %arg5[%c0_51, %c4_52, %c0_53, %c0_54], %84 {strides = array<i32>} : memref<1x5x8x128xf32, #tpu.memory_space<vmem>>, vector<1x1x8x128xf32>,
    } else {
    }
    return
  }
  func.func @transform_0(%arg0: i32, %arg1: i32) -> (i32, i32) {
    %c1_i32 = arith.constant 1 : i32
    %0 = arith.muli %arg0, %c1_i32 : i32
    %1 = arith.addi %0, %arg1 : i32
    %c0_i32 = arith.constant 0 : i32
    %c0_i32_0 = arith.constant 0 : i32
    return %1, %c0_i32 : i32, i32
  }
  func.func @transform_1(%arg0: i32, %arg1: i32) -> (i32, i32) {
    %c1_i32 = arith.constant 1 : i32
    %0 = arith.muli %arg0, %c1_i32 : i32
    %1 = arith.addi %0, %arg1 : i32
    %c0_i32 = arith.constant 0 : i32
    %c0_i32_0 = arith.constant 0 : i32
    return %1, %c0_i32 : i32, i32
  }
  func.func @transform_2(%arg0: i32, %arg1: i32) -> (i32, i32) {
    %c1_i32 = arith.constant 1 : i32
    %0 = arith.muli %arg0, %c1_i32 : i32
    %1 = arith.addi %0, %arg1 : i32
    %c0_i32 = arith.constant 0 : i32
    %c0_i32_0 = arith.constant 0 : i32
    return %1, %c0_i32 : i32, i32
  }
  func.func @transform_3(%arg0: i32, %arg1: i32) -> (i32, i32, i32, i32) {
    %c0_i32 = arith.constant 0 : i32
    %c0_i32_0 = arith.constant 0 : i32
    %c0_i32_1 = arith.constant 0 : i32
    %c0_i32_2 = arith.constant 0 : i32
    return %arg0, %c0_i32, %c0_i32_0, %c0_i32_1 : i32, i32, i32, i32
  }
}

</mosaic_0001>

<bundles_post_ra>
// kernel: tpu_custom_call.1
= control target key start
LH: loop header
LB: loop body
LE: loop exit
PB: predicated region body
PF: predicated region fallthrough
CT: control target
= control target key end

     0   :  { %8 = vsyncpa [#allocation3], 0  ;;  %s376_s0 = inlined_call_operand.hbm [shape: f32[4,128], index: 0, kind: input, shape index: {}]   ;;  %s377_s1 = inlined_call_operand.hbm [shape: f32[4,128], index: 1, kind: input, shape index: {}]   ;;  %s378_s2 = inlined_call_operand.vmem [shape: f32[4,128], index: 2, kind: input, shape index: {}]   ;;  %s379_s3 = inlined_call_operand.hbm [shape: f32[1,5,8,128], index: 3, kind: output, shape index: {}]  }
   0x1   :  { %9 = vsyncpa [#allocation6], 0 }
   0x2   :  { %10 = vsyncpa [#allocation4], 0 }
   0x3   :  { %19 = vsyncadd [#allocation3], 64  ;;  %s309_s12 = smov [#allocation2]   ;;  %s237_s16 = scalar_lea.hbm %s376_s0, 64 }
   0x4   :  { %s24_s13 = sshll.u32 %s309_s12, 4  ;;  %p238_p0 = scmp.ne.s32.totalorder %s376_s0, %s237_s16  ;;  %s25_s13 = int_to_ptr.vmem [resolvable:$true] %s24_s13 }
   0x5   :  { %p241_p1 = scmp.lt.u32.totalorder %s237_s16, %s376_s0 }
   0x7   :  { %p243_p2 = pnand %p241_p1, %p238_p0 }
   0x9   :  { %246 = shalt.err (!%p243_p2)
}
   0xa   :  { %s247_s21 = scalar_lea.vmem %s25_s13, 64  ;;  %s251_s22 = scalar_lea.vmem %s25_s13, 128 }
   0xb   :  { %p248_p3 = scmp.ne.s32.totalorder %s25_s13, %s247_s21  ;;  %p252_p4 = scmp.lt.s32.totalorder %s25_s13, %s25_s13 }
   0xc   :  { %p253_p5 = scmp.lt.s32.totalorder %s251_s22, %s247_s21 }
   0xe   :  { %p254_p6 = por %p253_p5, %p252_p4 }
  0x10   :  { %p255_p7 = pnand %p254_p6, %p248_p3 }
  0x12   :  { %258 = shalt.err (!%p255_p7)
}
  0x13   :  { %s310_s23 = smov 64   ;;  %s311_s24 = smov 4  }
  0x14   :  { %30 = dma.hbm_to_vmem [thread:$0]  %s376_s0, 64, %s25_s13, [#allocation3], %s310_s23, %s310_s23, %s311_s24  }
  0x15   :  { %39 = vsyncadd [#allocation6], 64  ;;  %s312_s27 = smov [#allocation5]   ;;  %s259_s4 = scalar_lea.hbm %s377_s1, 64 }
  0x16   :  { %s44_s28 = sshll.u32 %s312_s27, 4  ;;  %p260_p8 = scmp.ne.s32.totalorder %s377_s1, %s259_s4  ;;  %s45_s28 = int_to_ptr.vmem [resolvable:$true] %s44_s28 }
  0x17   :  { %p263_p9 = scmp.lt.u32.totalorder %s259_s4, %s377_s1 }
  0x19   :  { %p265_p10 = pnand %p263_p9, %p260_p8 }
  0x1b   :  { %268 = shalt.err (!%p265_p10)
}
  0x1c   :  { %s269_s9 = scalar_lea.vmem %s45_s28, 64  ;;  %s273_s0 = scalar_lea.vmem %s45_s28, 128 }
  0x1d   :  { %p270_p11 = scmp.ne.s32.totalorder %s45_s28, %s269_s9  ;;  %p274_p12 = scmp.lt.s32.totalorder %s45_s28, %s45_s28 }
  0x1e   :  { %p275_p13 = scmp.lt.s32.totalorder %s273_s0, %s269_s9 }
  0x20   :  { %p276_p0 = por %p275_p13, %p274_p12 }
  0x22   :  { %p277_p1 = pnand %p276_p0, %p270_p11 }
  0x24   :  { %280 = shalt.err (!%p277_p1)
}
  0x25   :  { %50 = dma.hbm_to_vmem [thread:$0]  %s377_s1, 64, %s45_s28, [#allocation6], %s310_s23, %s310_s23, %s311_s24  }
  0x26   :  { %303 = dma.done.wait [#allocation3], 128  }
  0x27   :  { %304 = vsyncadd [#allocation3], 4294967168 }
  0x28   :  { %305 = dma.done.wait [#allocation6], 128  }
  0x29   :  { %306 = vsyncadd [#allocation6], 4294967168  ;;  %v161_v0 = vlaneseq  ;;  %v108_v2 = vld [vmem:[#allocation2] sm:$0xff]  ;;  %v109_v3 = vld [vmem:[#allocation5] sm:$0xff]  ;;  %s313_s1 = smov [#allocation7]   ;;  %v314_v14 = vmov 0.0  }
  0x2a   :  { %v110_v4 = vld [vmem:[%s378_s2] sm:$0xff]  ;;  %v111_v5 = vmul.f32 0.5, %v108_v2  ;;  %v112_v6 = vsub.f32 %v108_v2, %v109_v3  ;;  %s206_s14 = sshll.u32 %s313_s1, 4  ;;  %s207_s14 = int_to_ptr.vmem [resolvable:$true] %s206_s14 }
  0x2b   :  { %v162_v1 = vshrl.u32 %v161_v0, 7  ;;  %v114_v7 = vadd.f32 %v110_v4, %v108_v2  ;;  %v116_v8 = vadd.f32 %v110_v4, %v109_v3  ;;  %s281_s2 = scalar_lea.vmem %s207_s14, 640  ;;  %p286_p3 = scmp.lt.s32.totalorder %s207_s14, %s207_s14 }
  0x2c   :  { %v113_v9 = vsub.f32 %v112_v6, %v111_v5  ;;  %p282_p2 = scmp.ne.s32.totalorder %s207_s14, %s281_s2  ;;  %p287_p4 = scmp.lt.s32.totalorder %s281_s2, %s281_s2 }
  0x2d   :  { %vm165_vm0 = vcmp.lt.s32.totalorder %v162_v1, 4  ;;  %v115_v10 = vsub.f32 %v111_v5, %v114_v7  ;;  %v117_v11 = vand.u32 2147483647, %v116_v8 }
  0x2e   :  { %vm166_vm1 = vcmp.gt.f32.partialorder %v113_v9, 0.0  ;;  %p288_p5 = por %p287_p4, %p286_p3 }
  0x2f   :  { %vm167_vm2 = vcmp.gt.f32.partialorder %v115_v10, 0.0  ;;  %v170_v12 = vsel %vm165_vm0, %v117_v11, 0.0  ;;  %vm168_vm3 = vmand %vm166_vm1, %vm165_vm0 }
  0x30   :  { %v172_v13 = vsel %vm168_vm3, %v113_v9, 0.0  ;;  %v227_v15 = vsel %vm168_vm3, 1.0, %v314_v14  ;;  %vm169_vm4 = vmand %vm167_vm2, %vm165_vm0  ;;  %200 = vst [vmem:[#allocation7 + $0x20] sm:$0xff] %v170_v12  ;;  %p289_p6 = pnand %p288_p5, %p282_p2 }
  0x31   :  { %v185_v16 = vsel %vm169_vm4, %v115_v10, 0.0  ;;  %v228_v17 = vsel %vm169_vm4, 1.0, %v314_v14  ;;  %175 = vst [vmem:[#allocation7] sm:$0xff] %v172_v13  ;;  %182 = vst [vmem:[#allocation7 + $0x8] sm:$0xff] %v227_v15 }
  0x32   :  { %188 = vst [vmem:[#allocation7 + $0x10] sm:$0xff] %v185_v16  ;;  %195 = vst [vmem:[#allocation7 + $0x18] sm:$0xff] %v228_v17 }
  0x33   :  { %292 = shalt.err (!%p289_p6)
}
  0x34   :  { %s293_s17 = scalar_lea.hbm %s379_s3, 640 }
  0x35   :  { %p294_p7 = scmp.ne.s32.totalorder %s379_s3, %s293_s17  ;;  %p297_p8 = scmp.lt.u32.totalorder %s293_s17, %s379_s3 }
  0x37   :  { %p299_p9 = pnand %p297_p8, %p294_p7 }
  0x39   :  { %302 = shalt.err (!%p299_p9)
}
  0x3a   :  { %s315_s22 = smov 128   ;;  %s316_s23 = smov 8  }
  0x3b   :  { %212 = dma.vmem_to_hbm [thread:$0]  %s207_s14, 640, %s379_s3, [#allocation4], %s315_s22, %s315_s22, %s316_s23  }
  0x3c   :  { %307 = dma.done.wait [#allocation4], 640  }
  0x3d   :  { %308 = vsyncadd [#allocation4], 4294966656 }
  0x3e   :  { %216 = vsyncpa [#allocation3], 1 }
  0x3f   :  { %217 = vsyncpa [#allocation6], 1 }
  0x40   :  { %218 = vsyncpa [#allocation4], 1 }

</bundles_post_ra>
